<compile_context>
chip_gen: v7x
topology: tpu7x:2x2x1
jax: 0.10.0
libtpu: 0.0.40
codegen_flags: <defaults>
</compile_context>

<pallas_src>
import jax
import jax.numpy as jnp
from jax.experimental import pallas as pl
from jax.experimental.pallas import tpu as pltpu

_LANE = 128
_MAX_LANE_TILE = 2048   # measured sweet spot for streaming (mem-bound) kernels


def _round_up(x, m):
    return -(-x // m) * m


def _vmem_capacity_bytes(default=64 * 1024 * 1024):
    """Per-generation VMEM capacity; conservative fallback if query fails."""
    try:
        cap = getattr(pltpu.get_tpu_info(), "vmem_capacity_bytes", None)
        if cap:
            return int(cap)
    except Exception:
        pass
    return default


def _scale_shift_kernel(scale_ref, bias_ref, x_ref, o_ref):
    # scale_ref/bias_ref: (1, TR, 1) f32 ; x_ref/o_ref: (1, TR, L)
    x = x_ref[0].astype(jnp.float32)
    o_ref[0] = (scale_ref[0] * x + bias_ref[0]).astype(o_ref.dtype)


def conditional_conv(x, condition, w_kernel, w_bias):
    """x: [B, C, H, W]; condition: [B, K]; w_kernel/w_bias: [C, K] (torch Linear layout)."""
    B, C, H, W = x.shape
    HW = H * W
    itemsize = jnp.dtype(x.dtype).itemsize
    sub_min = max(8, 32 // itemsize)          # dense sublane count: 8 f32 / 16 bf16

    # ---- hoisted K-contraction (tiny; done by XLA, in f32) --------------------
    cond_f32 = condition.astype(jnp.float32)
    scale = cond_f32 @ w_kernel.astype(jnp.float32).T    # [B, C]
    bias = cond_f32 @ w_bias.astype(jnp.float32).T       # [B, C]

    # ---- tile geometry, sized per-generation ---------------------------------
    vmem_cap = _vmem_capacity_bytes()
    target_block_bytes = max(1 << 20, vmem_cap // 16)    # ~4 MiB v7x, ~8 MiB v5e/v6e
    vmem_limit = min(vmem_cap // 2, 64 * 1024 * 1024)    # 32 MiB v7x, 64 MiB v5e/v6e

    hw_ceil = _round_up(HW, _LANE)
    lanes_cap = max(_LANE, (target_block_bytes // (sub_min * itemsize)) // _LANE * _LANE)
    L = min(hw_ceil, _MAX_LANE_TILE, lanes_cap)
    if C < sub_min:
        # Fold more spatial groups into the sublane axis so vregs stay dense.
        g_needed = -(-sub_min // C)
        L = max(_LANE, min(L, _round_up(-(-hw_ceil // g_needed), _LANE)))
    G = -(-HW // L)                     # spatial groups folded into sublane axis
    HW_pad = G * L                      # multiple of 128 (L is)
    R = C * G                           # folded rows

    tr_cap = max(sub_min, (target_block_bytes // (L * itemsize)) // sub_min * sub_min)
    TR = R if R <= tr_cap else tr_cap   # TR == R (full) or a multiple of sub_min
    n_row_blocks = -(-R // TR)

    # ---- reshape / pad inputs to the folded [B, R, L] layout ------------------
    x_flat = x.reshape(B, C, HW)
    if HW_pad != HW:
        x_flat = jnp.pad(x_flat, ((0, 0), (0, 0), (0, HW_pad - HW)))
    x_folded = x_flat.reshape(B, R, L)

    scale_rows = jnp.repeat(scale, G, axis=1)[:, :, None]   # [B, R, 1] f32
    bias_rows = jnp.repeat(bias, G, axis=1)[:, :, None]     # [B, R, 1] f32

    out_folded = pl.pallas_call(
        _scale_shift_kernel,
        out_shape=jax.ShapeDtypeStruct((B, R, L), x.dtype),
        grid=(B, n_row_blocks),
        in_specs=[
            pl.BlockSpec((1, TR, 1), lambda b, r: (b, r, 0)),   # scale rows
            pl.BlockSpec((1, TR, 1), lambda b, r: (b, r, 0)),   # bias rows
            pl.BlockSpec((1, TR, L), lambda b, r: (b, r, 0)),   # x block
        ],
        out_specs=pl.BlockSpec((1, TR, L), lambda b, r: (b, r, 0)),
        compiler_params=pltpu.CompilerParams(
            dimension_semantics=("parallel", "parallel"),
            vmem_limit_bytes=vmem_limit,
        ),
    )(scale_rows, bias_rows, x_folded)

    out = out_folded.reshape(B, C, HW_pad)
    if HW_pad != HW:
        out = out[:, :, :HW]
    return out.reshape(B, C, H, W)


def xavier_uniform(key, shape):
    # shape = (out_features, in_features) -> fan_in = in, fan_out = out
    fan_out, fan_in = shape
    bound = jnp.sqrt(6.0 / (fan_in + fan_out))
    return jax.random.uniform(key, shape, jnp.float32, minval=-bound, maxval=bound)


if __name__ == "__main__":
    B, C, H, W = 2, 4, 16, 16
    NUM_CLASSES = 10

    key = jax.random.PRNGKey(0)
    k_x, k_cond, k_wk, k_wb = jax.random.split(key, 4)

    x = jax.random.normal(k_x, (B, C, H, W), jnp.float32)
    condition = jax.random.normal(k_cond, (B, NUM_CLASSES), jnp.float32)
    w_kernel = xavier_uniform(k_wk, (C, NUM_CLASSES))
    w_bias = xavier_uniform(k_wb, (C, NUM_CLASSES))

    out = conditional_conv(x, condition, w_kernel, w_bias)
    out = jax.block_until_ready(out)

    # Pure-JAX reference for correctness
    ck = condition @ w_kernel.T          # [B, C]
    cb = condition @ w_bias.T            # [B, C]
    ref = ck[:, :, None, None] * x + cb[:, :, None, None]
    assert out.shape == (B, C, H, W)
    assert jnp.allclose(out, ref, atol=1e-5, rtol=1e-5)

    print("KERNEL_OK")
</pallas_src>

<mosaic_0001>
module attributes {stable_mosaic.version = 11 : i64} {
  func.func @_scale_shift_kernel(%arg0: i32, %arg1: i32, %arg2: memref<1x8x1xf32, #tpu.memory_space<vmem>>, %arg3: memref<1x8x1xf32, #tpu.memory_space<vmem>>, %arg4: memref<1x8x128xf32, #tpu.memory_space<vmem>>, %arg5: memref<1x8x128xf32, #tpu.memory_space<vmem>>) attributes {dimension_semantics = [#tpu.dimension_semantics<parallel>, #tpu.dimension_semantics<parallel>], iteration_bounds = array<i64: 2, 1>, scalar_prefetch = 0 : i64, scratch_operands = 0 : i64, tpu.core_type = #tpu.core_type<tc>, window_params = [{transform_indices = @transform_0, window_bounds = array<i64: 1, 8, 1>}, {transform_indices = @transform_1, window_bounds = array<i64: 1, 8, 1>}, {transform_indices = @transform_2, window_bounds = array<i64: 1, 8, 128>}, {transform_indices = @transform_3, window_bounds = array<i64: 1, 8, 128>}]} {
    %c0 = arith.constant 0 : index
    %c0_0 = arith.constant 0 : index
    %c0_1 = arith.constant 0 : index
    %0 = vector.load %arg4[%c0, %c0_0, %c0_1] : memref<1x8x128xf32, #tpu.memory_space<vmem>>, vector<1x8x128xf32>
    %1 = vector.shape_cast %0 : vector<1x8x128xf32> to vector<8x128xf32>
    %c0_2 = arith.constant 0 : index
    %c0_3 = arith.constant 0 : index
    %c0_4 = arith.constant 0 : index
    %2 = vector.load %arg2[%c0_2, %c0_3, %c0_4] : memref<1x8x1xf32, #tpu.memory_space<vmem>>, vector<1x8x1xf32>
    %3 = vector.shape_cast %2 : vector<1x8x1xf32> to vector<8x1xf32>
    %4 = vector.broadcast %3 : vector<8x1xf32> to vector<8x128xf32>
    %5 = arith.mulf %4, %1 : vector<8x128xf32>
    %c0_5 = arith.constant 0 : index
    %c0_6 = arith.constant 0 : index
    %c0_7 = arith.constant 0 : index
    %6 = vector.load %arg3[%c0_5, %c0_6, %c0_7] : memref<1x8x1xf32, #tpu.memory_space<vmem>>, vector<1x8x1xf32>
    %7 = vector.shape_cast %6 : vector<1x8x1xf32> to vector<8x1xf32>
    %8 = vector.broadcast %7 : vector<8x1xf32> to vector<8x128xf32>
    %9 = arith.addf %5, %8 : vector<8x128xf32>
    %c0_8 = arith.constant 0 : index
    %c0_9 = arith.constant 0 : index
    %c0_10 = arith.constant 0 : index
    %10 = vector.load %arg5[%c0_8, %c0_9, %c0_10] : memref<1x8x128xf32, #tpu.memory_space<vmem>>, vector<1x8x128xf32>
    %11 = vector.shape_cast %10 : vector<1x8x128xf32> to vector<8x128xf32>
    %12 = vector.shape_cast %9 : vector<8x128xf32> to vector<1x8x128xf32>
    tpu.vector_store %arg5[%c0_8, %c0_9, %c0_10], %12 {strides = array<i32>} : memref<1x8x128xf32, #tpu.memory_space<vmem>>, vector<1x8x128xf32>,
    return
  }
  func.func @transform_0(%arg0: i32, %arg1: i32) -> (i32, i32, i32) {
    %c0_i32 = arith.constant 0 : i32
    %c0_i32_0 = arith.constant 0 : i32
    return %arg0, %arg1, %c0_i32 : i32, i32, i32
  }
  func.func @transform_1(%arg0: i32, %arg1: i32) -> (i32, i32, i32) {
    %c0_i32 = arith.constant 0 : i32
    %c0_i32_0 = arith.constant 0 : i32
    return %arg0, %arg1, %c0_i32 : i32, i32, i32
  }
  func.func @transform_2(%arg0: i32, %arg1: i32) -> (i32, i32, i32) {
    %c0_i32 = arith.constant 0 : i32
    %c0_i32_0 = arith.constant 0 : i32
    return %arg0, %arg1, %c0_i32 : i32, i32, i32
  }
  func.func @transform_3(%arg0: i32, %arg1: i32) -> (i32, i32, i32) {
    %c0_i32 = arith.constant 0 : i32
    %c0_i32_0 = arith.constant 0 : i32
    return %arg0, %arg1, %c0_i32 : i32, i32, i32
  }
}

</mosaic_0001>

<bundles_post_ra>
// kernel: tpu_custom_call.1
= control target key start
LH: loop header
LB: loop body
LE: loop exit
PB: predicated region body
PF: predicated region fallthrough
CT: control target
= control target key end

     0   :  { %8 = vsyncpa [#allocation3], 0  ;;  %s669_s0 = inlined_call_operand.vmem [shape: f32[2,8,1], index: 0, kind: input, shape index: {}]   ;;  %s670_s1 = inlined_call_operand.vmem [shape: f32[2,8,1], index: 1, kind: input, shape index: {}]   ;;  %s671_s2 = inlined_call_operand.vmem [shape: f32[2,8,128], index: 2, kind: input, shape index: {}]   ;;  %s672_s3 = inlined_call_operand.hbm [shape: f32[2,8,128], index: 3, kind: output, shape index: {}]  }
   0x1   :  { %10 = vsyncpa [#allocation3 + $0x1], 0  ;;  %s551_s12 = smov 0   ;;  %s553_s13 = smov 0  }
   0x2   :  { %s555_s14 = smov 0   ;;  %s557_s15 = smov 0  }
   0x3   :  { %s559_s16 = smov 0   ;;  %s561_s17 = smov 0  }
   0x4 LB: > { %s379_s18 = sadd.s32 4294967295, %s527_s17   ;;  %s380_s19 = sadd.s32 4294967294, %s527_s17   ;;  %s527_s17 = sphi %s561_s17, %s16_s17   ;;  %s523_s16 = sphi %s559_s16, %s679_s16   ;;  %s519_s15 = sphi %s557_s15, %s678_s15   ;;  %s515_s14 = sphi %s555_s14, %s677_s14   ;;  %s511_s13 = sphi %s553_s13, %s676_s13   ;;  %s507_s12 = sphi %s551_s12, %s675_s12  }
   0x5   : > { %s28_s20 = sadd.s32 1, %s523_s16  ;;  %s121_s21 = sadd.s32 1, %s515_s14 }
   0x6   : > { %p30_p0 = scmp.ge.s32.totalorder %s28_s20, 2  ;;  %p131_p1 = scmp.ne.s32.totalorder %s515_s14, %s511_s13 }
   0x7   : > { %p132_p2 = scmp.eq.s32.totalorder %s379_s18, 1  ;;  %p137_p3 = scmp.ne.s32.totalorder %s511_s13, %s507_s12 }
   0x8   : > { %s681_s20 = smov (%p30_p0, %s28_s20), 0  ;;  %p138_p5 = scmp.eq.s32.totalorder %s380_s19, 1 }
   0x9   : > { %p591_p4 = por %p132_p2, %p131_p1  ;;  %s116_s23 = ssub.s32 %s523_s16, %s681_s20 }
   0xa   : > { %p383_p6 = scmp.ge.s32.totalorder %s527_s17, 1  ;;  %p119_p7 = scmp.eq.s32.totalorder %s116_s23, 0 }
   0xb   : > { %p598_p8 = por %p138_p5, %p137_p3  ;;  %p186_p9 = scmp.lt.s32.totalorder %s527_s17, 3 }
   0xc   : > { %s604_s25 = scalar_select %p119_p7, %s515_s14, %s121_s21  }
   0xd   : > { %p187_p10 = pnand %p383_p6, %p186_p9 }
   0xe   : > { %p226_p11 = scmp.lt.s32.totalorder (!%p187_p10), %s519_s15, 1  ;;  %v529_v0 = vmov (!%p187_p10), 0   ;;  %s223_s7 = sand.u32 (!%p187_p10), 1, %s511_s13  }
   0xf   : > { %190 = sbr.rel (%p187_p10) target bundleno = 175 (0xaf), region = 32  ;;  %448 = vset.pattern.permute.xlu0 (!%p187_p10), %v529_v0  ;;  %s384_s8 = sshll.u32 (!%p187_p10), %s223_s7, 3 }
  0x10   : > { %s389_s18 = sshll.u32 (!%p187_p10), %s519_s15, 7  ;;  %s225_s19 = scalar_lea.vmem (!%p187_p10), [#allocation2], %s384_s8 }
  0x11   : > { %s278_s21 = sshll.u32 (!%p187_p10), %s225_s19, 4  ;;  %s622_s28 = scalar_lea.hbm (!%p187_p10), %s672_s3, %s389_s18  ;;  %s624_s21 = int_to_ptr.vmem [resolvable:$true] %s278_s21 }
  0x12   : > { %s449_s29 = scalar_lea.vmem (!%p187_p10), %s624_s21, 128 }
  0x13   : > { %p450_p12 = scmp.ne.s32.totalorder (!%p187_p10), %s624_s21, %s449_s29 }
  0x15   : > { %p451_p13 = pnand (!%p187_p10), %p450_p12, %p591_p4 }
  0x16   : > { %s227_s26 = scalar_select %p226_p11, %s519_s15, 1 }
  0x17   : > { %p452_p0 = pneg %p451_p13  ;;  %s530_s15 = smov [#allocation2]  }
  0x18   : > { %s385_s27 = sshll.u32 %s227_s26, 3 }
  0x19   : > { %s232_s30 = scalar_lea.vmem %s669_s0, %s385_s27  ;;  %s239_s6 = scalar_lea.vmem %s670_s1, %s385_s27 }
  0x1a   : > { %v248_v1 = vld [vmem:[%s232_s30] sm:$0xff]  ;;  %s246_s11 = scalar_lea.vmem %s671_s2, %s385_s27  ;;  %s264_s27 = scalar_lea.sflag [#allocation3], %s223_s7 }
  0x1b   : > { %251 = vperm.xlu0 %448, %v248_v1   ;;  %v255_v2 = vld [vmem:[%s239_s6] sm:$0xff]  ;;  %s453_s30 = sshll.u32 %s530_s15, 4  ;;  %s454_s30 = int_to_ptr.vmem [resolvable:$false] %s453_s30 }
  0x1c   : > { %v247_v3 = vld [vmem:[%s246_s11] sm:$0xff]  ;;  %s455_s4 = scalar_lea.vmem %s454_s30, 256  ;;  %p456_p1 = scmp.lt.s32.totalorder %s624_s21, %s454_s30 }
  0x1d   : > { %p457_p2 = scmp.lt.s32.totalorder %s455_s4, %s449_s29 }
  0x1f   : > { %258 = vperm.xlu0 %448, %v255_v2   ;;  %p458_p3 = por %p457_p2, %p456_p1 }
  0x21   : > { %p459_p5 = pnand %p458_p3, %p452_p0 }
  0x9a   : > { %v252_v4 = vpop.permute.xlu0 %251 }
  0x9b   : > { %v254_v5 = vmul.f32 %v252_v4, %v247_v3 }
  0x9e   : > { %v259_v6 = vpop.permute.xlu0 %258 }
  0x9f   : > { %v261_v7 = vadd.f32 %v259_v6, %v254_v5 }
  0xa1   : > { %262 = vst [vmem:[%s225_s19] sm:$0xff] %v261_v7 }
  0xa2   : > { %462 = shalt.err (!%p459_p5)
}
  0xa3   : > { %s463_s5 = scalar_lea.hbm %s622_s28, 128  ;;  %s467_s8 = scalar_lea.hbm %s672_s3, 256 }
  0xa4   : > { %p464_p6 = scmp.ne.s32.totalorder %s622_s28, %s463_s5  ;;  %p468_p10 = scmp.lt.u32.totalorder %s622_s28, %s672_s3 }
  0xa5   : > { %p469_p11 = scmp.lt.u32.totalorder %s467_s8, %s463_s5  ;;  %p471_p13 = scmp.lt.u32.totalorder %s463_s5, %s622_s28 }
  0xa6   : > { %p465_p7 = pnand %p464_p6, %p591_p4 }
  0xa7   : > { %p470_p12 = por %p469_p11, %p468_p10 }
  0xa8   : > { %p466_p9 = pneg %p465_p7 }
  0xa9   : > { %p472_p0 = por %p471_p13, %p470_p12 }
  0xab   : > { %p473_p1 = pnand %p472_p0, %p466_p9 }
  0xad   : > { %476 = shalt.err (!%p473_p1)
}
  0xae   : > { %392 = dma.vmem_to_hbm [thread:$0]  (%p591_p4), %s624_s21, 128, %s622_s28, %s264_s27  }
  0xaf PF: > { %p398_p2 = scmp.ge.s32.totalorder %s527_s17, 2  ;;  %s290_s11 = sand.u32 1, %s507_s12  }
  0xb0   : > { %s291_s18 = scalar_lea.sflag [#allocation3], %s290_s11 }
  0xb1   : > { %p395_p3 = pnand %p398_p2, %p598_p8 }
  0xb3   : > { %502 = dma.done.wait (!%p395_p3), %s291_s18, 128  }
  0xb4   : > { %504 = vsyncadd (!%p395_p3), %s291_s18, 4294967168  ;;  %s16_s17 = sadd.s32 1, %s527_s17   ;;  %s675_s12 = smov %s511_s13 }
  0xb5   : > { %p13_p5 = scmp.ge.s32.totalorder %s16_s17, 4   ;;  %s676_s13 = smov %s515_s14 }
  0xb6   : > { %s677_s14 = smov %s604_s25  ;;  %s678_s15 = smov %s523_s16 }
  0xb7   : > { %s679_s16 = smov %s681_s20  ;;  %15 = sbr.rel (!%p13_p5) target bundleno = 4 (0x4), region = 73 }
  0xbe   :  { %296 = vsyncpa [#allocation3], 1 }
  0xbf   :  { %298 = vsyncpa [#allocation3 + $0x1], 1 }

</bundles_post_ra>
